<compile_context>
chip_gen: v5e
topology: v5e:2x2
jax: 0.10.0
libtpu: 0.0.40
codegen_flags: <defaults>
</compile_context>

<pallas_src>
import functools

import jax
import jax.numpy as jnp
from jax.experimental import pallas as pl
from jax.experimental.pallas import tpu as pltpu

_LANE = 128
_SUBLANE = 8
_TILE_B = 256  # batch tile for the gridded (large-batch) path


def _round_up(x, m):
    return ((x + m - 1) // m) * m


# ---------------------------------------------------------------------------
# Kernels
# ---------------------------------------------------------------------------
def _actor_kernel_small(x_ref, w1_ref, b1_ref, w2_ref, b2_ref, w3_ref, b3_ref,
                        o_ref, xs_ref):
    """Single-block kernel (no grid).

    x / out are unpadded; weights/biases are pre-padded to lane-aligned shapes.
    x is zero-padded in-VMEM (scratch xs_ref) so all three matmuls run on
    MXU-aligned (8k x 128k) shapes; the result is sliced back to
    (batch, n_actions) before the store.  Zero padding is exact because
    tanh(0)=0 and padded weight rows/cols and biases are zero.
    """
    batch, n_obs = x_ref.shape
    n_actions = o_ref.shape[1]

    xs_ref[...] = jnp.zeros_like(xs_ref)
    xs_ref[:batch, :n_obs] = x_ref[...]
    x = xs_ref[...]

    h1 = jnp.tanh(
        jnp.dot(x, w1_ref[...], preferred_element_type=jnp.float32) + b1_ref[...]
    )
    h2 = jnp.tanh(
        jnp.dot(h1, w2_ref[...], preferred_element_type=jnp.float32) + b2_ref[...]
    )
    h3 = jnp.tanh(
        jnp.dot(h2, w3_ref[...], preferred_element_type=jnp.float32) + b3_ref[...]
    )
    o_ref[...] = h3[:batch, :n_actions].astype(o_ref.dtype)


def _actor_kernel_tiled(x_ref, w1_ref, b1_ref, w2_ref, b2_ref, w3_ref, b3_ref,
                        o_ref):
    """Gridded kernel: one batch tile per grid step, weights stay VMEM-resident."""
    h1 = jnp.tanh(
        jnp.dot(x_ref[...], w1_ref[...], preferred_element_type=jnp.float32)
        + b1_ref[...]
    )
    h2 = jnp.tanh(
        jnp.dot(h1, w2_ref[...], preferred_element_type=jnp.float32) + b2_ref[...]
    )
    o_ref[...] = jnp.tanh(
        jnp.dot(h2, w3_ref[...], preferred_element_type=jnp.float32) + b3_ref[...]
    ).astype(o_ref.dtype)


# ---------------------------------------------------------------------------
# Parameter preparation (done ONCE, outside the per-step hot path)
# ---------------------------------------------------------------------------
def prepare_actor_params(params):
    """Zero-pads weights/biases to lane-friendly shapes (hoisted out of forward)."""
    w1, b1 = params["w1"], params["b1"]
    w2, b2 = params["w2"], params["b2"]
    w3, b3 = params["w3"], params["b3"]
    n_obs, hidden = w1.shape
    n_actions = w3.shape[1]

    pin = _round_up(n_obs, _LANE)
    ph = _round_up(hidden, _LANE)
    pout = _round_up(n_actions, _LANE)

    def pad2(a, shape):
        a = a.astype(jnp.float32)
        return jnp.pad(a, [(0, t - s) for s, t in zip(a.shape, shape)])

    return {
        "w1": pad2(w1, (pin, ph)),
        "b1": pad2(b1.reshape(1, -1), (1, ph)),
        "w2": pad2(w2, (ph, ph)),
        "b2": pad2(b2.reshape(1, -1), (1, ph)),
        "w3": pad2(w3, (ph, pout)),
        "b3": pad2(b3.reshape(1, -1), (1, pout)),
    }


# ---------------------------------------------------------------------------
# Forward pass
# ---------------------------------------------------------------------------
@functools.partial(jax.jit, static_argnames=("n_actions",))
def actor_forward(x, padded_params, n_actions):
    w1, b1 = padded_params["w1"], padded_params["b1"]
    w2, b2 = padded_params["w2"], padded_params["b2"]
    w3, b3 = padded_params["w3"], padded_params["b3"]

    batch, n_obs = x.shape
    pin, ph = w1.shape
    pout = w3.shape[1]
    if x.dtype != jnp.float32:
        x = x.astype(jnp.float32)

    param_bytes = 4 * (pin * ph + ph + ph * ph + ph + ph * pout + pout)

    if batch <= _TILE_B:
        # --- small-batch path: single block, no wrapper pad/slice ---------
        pb = _round_up(batch, _SUBLANE)
        cost = pl.CostEstimate(
            flops=2 * pb * (pin * ph + ph * ph + ph * pout),
            transcendentals=pb * (2 * ph + pout),
            bytes_accessed=param_bytes + 4 * (batch * n_obs + batch * n_actions),
        )
        return pl.pallas_call(
            _actor_kernel_small,
            out_shape=jax.ShapeDtypeStruct((batch, n_actions), jnp.float32),
            in_specs=[pl.BlockSpec(memory_space=pltpu.VMEM)] * 7,
            out_specs=pl.BlockSpec(memory_space=pltpu.VMEM),
            scratch_shapes=[pltpu.VMEM((pb, pin), jnp.float32)],
            cost_estimate=cost,
        )(x, w1, b1, w2, b2, w3, b3)

    # --- large-batch path: 1-D grid over batch, weights VMEM-resident -----
    tb = _TILE_B
    pbg = _round_up(batch, tb)
    xp = jnp.pad(x, ((0, pbg - batch), (0, pin - n_obs)))
    cost = pl.CostEstimate(
        flops=2 * pbg * (pin * ph + ph * ph + ph * pout),
        transcendentals=pbg * (2 * ph + pout),
        bytes_accessed=param_bytes + 4 * (pbg * pin + pbg * pout),
    )
    out = pl.pallas_call(
        _actor_kernel_tiled,
        out_shape=jax.ShapeDtypeStruct((pbg, pout), jnp.float32),
        grid_spec=pltpu.PrefetchScalarGridSpec(
            num_scalar_prefetch=0,
            grid=(pbg // tb,),
            in_specs=[
                pl.BlockSpec((tb, pin), lambda i: (i, 0)),   # x tile
                pl.BlockSpec((pin, ph), lambda i: (0, 0)),   # w1 (resident)
                pl.BlockSpec((1, ph), lambda i: (0, 0)),     # b1
                pl.BlockSpec((ph, ph), lambda i: (0, 0)),    # w2
                pl.BlockSpec((1, ph), lambda i: (0, 0)),     # b2
                pl.BlockSpec((ph, pout), lambda i: (0, 0)),  # w3
                pl.BlockSpec((1, pout), lambda i: (0, 0)),   # b3
            ],
            out_specs=pl.BlockSpec((tb, pout), lambda i: (i, 0)),
        ),
        compiler_params=pltpu.CompilerParams(
            dimension_semantics=("parallel",)),
        cost_estimate=cost,
    )(xp, w1, b1, w2, b2, w3, b3)
    return out[:batch, :n_actions]


# ---------------------------------------------------------------------------
# Init / reference
# ---------------------------------------------------------------------------
def init_actor_params(key, n_observations, n_actions, hidden=64):
    """Mimics PyTorch nn.Linear default init U[-1/sqrt(fan_in), +1/sqrt(fan_in)].

    Weights stored as (in_features, out_features) (transpose of nn.Linear.weight),
    so forward computes x @ W + b.
    """
    ks = jax.random.split(key, 6)

    def linear(kw, kb, fan_in, fan_out):
        bound = 1.0 / jnp.sqrt(jnp.float32(fan_in))
        w = jax.random.uniform(kw, (fan_in, fan_out), jnp.float32, -bound, bound)
        b = jax.random.uniform(kb, (fan_out,), jnp.float32, -bound, bound)
        return w, b

    w1, b1 = linear(ks[0], ks[1], n_observations, hidden)
    w2, b2 = linear(ks[2], ks[3], hidden, hidden)
    w3, b3 = linear(ks[4], ks[5], hidden, n_actions)
    logstd = jnp.zeros((n_actions,), jnp.float32)  # unused in forward (matches PyTorch)
    return {"w1": w1, "b1": b1, "w2": w2, "b2": b2, "w3": w3, "b3": b3,
            "logstd": logstd}


def actor_reference(x, params):
    h1 = jnp.tanh(x @ params["w1"] + params["b1"])
    h2 = jnp.tanh(h1 @ params["w2"] + params["b2"])
    return jnp.tanh(h2 @ params["w3"] + params["b3"])


if __name__ == "__main__":
    # Pendulum-v1: n_observations = 3, n_actions = 1
    n_observations, n_actions = 3, 1
    batch = 4

    key = jax.random.PRNGKey(0)
    kx, kp, kx2 = jax.random.split(key, 3)
    params = init_actor_params(kp, n_observations, n_actions)
    padded_params = prepare_actor_params(params)  # padded ONCE, outside hot path

    # Small-batch (single-block) path
    x = jax.random.normal(kx, (batch, n_observations), jnp.float32)
    out = jax.block_until_ready(actor_forward(x, padded_params, n_actions))
    ref = actor_reference(x, params)
    assert out.shape == (batch, n_actions), out.shape
    assert jnp.allclose(out, ref, atol=1e-5, rtol=1e-5), (out, ref)

    # Large-batch (gridded, megacore-parallel) path
    xb = jax.random.normal(kx2, (1000, n_observations), jnp.float32)
    outb = jax.block_until_ready(actor_forward(xb, padded_params, n_actions))
    refb = actor_reference(xb, params)
    assert outb.shape == (1000, n_actions), outb.shape
    assert jnp.allclose(outb, refb, atol=1e-5, rtol=1e-5)

    print("KERNEL_OK")
</pallas_src>

<mosaic_0001>
module attributes {stable_mosaic.version = 11 : i64} {
  func.func @_actor_kernel_small(%arg0: memref<4x3xf32, #tpu.memory_space<vmem>>, %arg1: memref<128x128xf32, #tpu.memory_space<vmem>>, %arg2: memref<1x128xf32, #tpu.memory_space<vmem>>, %arg3: memref<128x128xf32, #tpu.memory_space<vmem>>, %arg4: memref<1x128xf32, #tpu.memory_space<vmem>>, %arg5: memref<128x128xf32, #tpu.memory_space<vmem>>, %arg6: memref<1x128xf32, #tpu.memory_space<vmem>>, %arg7: memref<4x1xf32, #tpu.memory_space<vmem>>, %arg8: memref<8x128xf32, #tpu.memory_space<vmem>>) attributes {dimension_semantics = [], scalar_prefetch = 0 : i64, scratch_operands = 1 : i64, tpu.core_type = #tpu.core_type<tc>} {
    %cst = arith.constant 0.000000e+00 : f32
    %0 = vector.broadcast %cst : f32 to vector<8x128xf32>
    %c0 = arith.constant 0 : index
    %c0_0 = arith.constant 0 : index
    %1 = vector.load %arg8[%c0, %c0_0] : memref<8x128xf32, #tpu.memory_space<vmem>>, vector<8x128xf32>
    tpu.vector_store %arg8[%c0, %c0_0], %0 {strides = array<i32>} : memref<8x128xf32, #tpu.memory_space<vmem>>, vector<8x128xf32>,
    %c0_1 = arith.constant 0 : index
    %c0_2 = arith.constant 0 : index
    %2 = vector.load %arg0[%c0_1, %c0_2] : memref<4x3xf32, #tpu.memory_space<vmem>>, vector<4x3xf32>
    %c0_3 = arith.constant 0 : index
    %c0_4 = arith.constant 0 : index
    %3 = vector.load %arg8[%c0_3, %c0_4] : memref<8x128xf32, #tpu.memory_space<vmem>>, vector<4x3xf32>
    tpu.vector_store %arg8[%c0_3, %c0_4], %2 {strides = array<i32>} : memref<8x128xf32, #tpu.memory_space<vmem>>, vector<4x3xf32>,
    %c0_5 = arith.constant 0 : index
    %c0_6 = arith.constant 0 : index
    %4 = vector.load %arg8[%c0_5, %c0_6] : memref<8x128xf32, #tpu.memory_space<vmem>>, vector<8x128xf32>
    %c0_7 = arith.constant 0 : index
    %c0_8 = arith.constant 0 : index
    %5 = vector.load %arg1[%c0_7, %c0_8] : memref<128x128xf32, #tpu.memory_space<vmem>>, vector<128x128xf32>
    %cst_9 = arith.constant dense<0.000000e+00> : vector<8x128xf32>
    %6 = tpu.matmul %4, %5, %cst_9 {dimension_numbers = #tpu.dot_dimension_numbers<[1], [0], [0], [1], [0, 0, 1, 1], [], []>} : vector<8x128xf32>, vector<128x128xf32>, vector<8x128xf32> -> vector<8x128xf32>
    %c0_10 = arith.constant 0 : index
    %c0_11 = arith.constant 0 : index
    %7 = vector.load %arg2[%c0_10, %c0_11] : memref<1x128xf32, #tpu.memory_space<vmem>>, vector<1x128xf32>
    %8 = vector.broadcast %7 : vector<1x128xf32> to vector<8x128xf32>
    %9 = arith.addf %6, %8 : vector<8x128xf32>
    %10 = math.tanh %9 : vector<8x128xf32>
    %c0_12 = arith.constant 0 : index
    %c0_13 = arith.constant 0 : index
    %11 = vector.load %arg3[%c0_12, %c0_13] : memref<128x128xf32, #tpu.memory_space<vmem>>, vector<128x128xf32>
    %cst_14 = arith.constant dense<0.000000e+00> : vector<8x128xf32>
    %12 = tpu.matmul %10, %11, %cst_14 {dimension_numbers = #tpu.dot_dimension_numbers<[1], [0], [0], [1], [0, 0, 1, 1], [], []>} : vector<8x128xf32>, vector<128x128xf32>, vector<8x128xf32> -> vector<8x128xf32>
    %c0_15 = arith.constant 0 : index
    %c0_16 = arith.constant 0 : index
    %13 = vector.load %arg4[%c0_15, %c0_16] : memref<1x128xf32, #tpu.memory_space<vmem>>, vector<1x128xf32>
    %14 = vector.broadcast %13 : vector<1x128xf32> to vector<8x128xf32>
    %15 = arith.addf %12, %14 : vector<8x128xf32>
    %16 = math.tanh %15 : vector<8x128xf32>
    %c0_17 = arith.constant 0 : index
    %c0_18 = arith.constant 0 : index
    %17 = vector.load %arg5[%c0_17, %c0_18] : memref<128x128xf32, #tpu.memory_space<vmem>>, vector<128x128xf32>
    %cst_19 = arith.constant dense<0.000000e+00> : vector<8x128xf32>
    %18 = tpu.matmul %16, %17, %cst_19 {dimension_numbers = #tpu.dot_dimension_numbers<[1], [0], [0], [1], [0, 0, 1, 1], [], []>} : vector<8x128xf32>, vector<128x128xf32>, vector<8x128xf32> -> vector<8x128xf32>
    %c0_20 = arith.constant 0 : index
    %c0_21 = arith.constant 0 : index
    %19 = vector.load %arg6[%c0_20, %c0_21] : memref<1x128xf32, #tpu.memory_space<vmem>>, vector<1x128xf32>
    %20 = vector.broadcast %19 : vector<1x128xf32> to vector<8x128xf32>
    %21 = arith.addf %18, %20 : vector<8x128xf32>
    %22 = math.tanh %21 : vector<8x128xf32>
    %23 = vector.extract_strided_slice %22 {offsets = [0, 0], sizes = [4, 1], strides = [1, 1]} : vector<8x128xf32> to vector<4x1xf32>
    %c0_22 = arith.constant 0 : index
    %c0_23 = arith.constant 0 : index
    %24 = vector.load %arg7[%c0_22, %c0_23] : memref<4x1xf32, #tpu.memory_space<vmem>>, vector<4x1xf32>
    tpu.vector_store %arg7[%c0_22, %c0_23], %23 {strides = array<i32>} : memref<4x1xf32, #tpu.memory_space<vmem>>, vector<4x1xf32>,
    return
  }
}

</mosaic_0001>

<bundles_post_ra>
// kernel: actor_forward.1
= control target key start
LH: loop header
LB: loop body
LE: loop exit
PB: predicated region body
PF: predicated region fallthrough
CT: control target
= control target key end

     0   :  { %12 = vsyncpa [#allocation4], 0  ;;  %s452_s0 = inlined_call_operand.hbm [shape: f32[4,3], index: 0, kind: input, shape index: {}]   ;;  %s453_s1 = inlined_call_operand.hbm [shape: f32[128,128], index: 1, kind: input, shape index: {}]   ;;  %s454_s2 = inlined_call_operand.hbm [shape: f32[1,128], index: 2, kind: input, shape index: {}]   ;;  %s455_s3 = inlined_call_operand.hbm [shape: f32[128,128], index: 3, kind: input, shape index: {}]   ;;  %s456_s4 = inlined_call_operand.vmem [shape: f32[1,128], index: 4, kind: input, shape index: {}]   ;;  %s457_s5 = inlined_call_operand.hbm [shape: f32[128,128], index: 5, kind: input, shape index: {}]   ;;  %s458_s6 = inlined_call_operand.vmem [shape: f32[1,128], index: 6, kind: input, shape index: {}]   ;;  %s459_s7 = inlined_call_operand.vmem [shape: f32[4,1], index: 7, kind: output, shape index: {}]  }
   0x1   :  { %13 = vsyncpa [#allocation6], 0  ;;  %s30_s26 = sshll.u32 %s453_s1, 4  ;;  %s31_s26 = int_to_ptr.hbm [resolvable:$true] %s30_s26 }
   0x2   :  { %14 = vsyncpa [#allocation9], 0  ;;  %s380_s27 = smov [#allocation5]   ;;  %s54_s8 = sshll.u32 %s455_s3, 4  ;;  %s55_s8 = int_to_ptr.hbm [resolvable:$true] %s54_s8 }
   0x3   :  { %s32_s28 = sshll.u32 %s380_s27, 4  ;;  %s381_s9 = smov 128   ;;  %s33_s28 = int_to_ptr.vmem [resolvable:$true] %s32_s28 }
   0x4   :  { %s382_s10 = smov 8   ;;  %s383_s11 = smov [#allocation8]  }
   0x5   :  { %38 = dma.hbm_to_vmem [thread:$0]  %s31_s26, 2048, %s33_s28, [#allocation6], %s381_s9, %s381_s9, %s382_s10  }
   0x6   :  { %s56_s12 = sshll.u32 %s383_s11, 4  ;;  %s20_s15 = sshll.u32 %s452_s0, 4  ;;  %s57_s12 = int_to_ptr.vmem [resolvable:$true] %s56_s12  ;;  %s21_s15 = int_to_ptr.hbm [resolvable:$true] %s20_s15 }
   0x7   :  { %62 = dma.hbm_to_vmem [thread:$0]  %s55_s8, 2048, %s57_s12, [#allocation9], %s381_s9, %s381_s9, %s382_s10  }
   0x8   :  { %s44_s17 = sshll.u32 %s454_s2, 4  ;;  %s384_s18 = smov [#allocation3]   ;;  %s45_s17 = int_to_ptr.hbm [resolvable:$true] %s44_s17 }
   0x9   :  { %s22_s19 = sshll.u32 %s384_s18, 4  ;;  %s385_s3 = smov [#allocation7]   ;;  %s23_s19 = int_to_ptr.vmem [resolvable:$true] %s22_s19 }
   0xa   :  { %25 = dma.hbm_to_vmem [thread:$0]  %s21_s15, 64, %s23_s19, [#allocation4]  }
   0xb   :  { %s46_s20 = sshll.u32 %s385_s3, 4  ;;  %s69_s23 = sshll.u32 %s457_s5, 4  ;;  %s47_s20 = int_to_ptr.vmem [resolvable:$true] %s46_s20  ;;  %s70_s23 = int_to_ptr.hbm [resolvable:$true] %s69_s23 }
   0xc   :  { %49 = dma.hbm_to_vmem [thread:$0]  %s45_s17, 16, %s47_s20, [#allocation6]  }
   0xd   :  { %s386_s0 = smov [#allocation10]  }
   0xe   :  { %s71_s24 = sshll.u32 %s386_s0, 4  ;;  %s72_s24 = int_to_ptr.vmem [resolvable:$true] %s71_s24 }
   0xf   :  { %77 = dma.hbm_to_vmem [thread:$0]  %s70_s23, 2048, %s72_s24, [#allocation9], %s381_s9, %s381_s9, %s382_s10  }
  0x10   :  { %374 = dma.done.wait [#allocation4], 64  }
  0x11   :  { %375 = vsyncadd [#allocation4], 4294967232 }
  0x12   :  { %376 = dma.done.wait [#allocation6], 2064  }
  0x13   :  { %377 = vsyncadd [#allocation6], 4294965232 }
  0x14   :  { %378 = dma.done.wait [#allocation9], 4096  }
  0x15   :  { %379 = vsyncadd [#allocation9], 4294963200  ;;  %v387_v0 = vmov 0.0   ;;  %v120_v1 = vld [vmem:[#allocation5 + $0x78] sm:$0xff]  ;;  %v119_v2 = vld [vmem:[#allocation5 + $0x70] sm:$0xff]  ;;  %vm102_vm0 = vcmask 19456  }
  0x16   :  { %100 = vst [vmem:[#allocation2] sm:$0xff] %v387_v0  ;;  %125 = vmatpush.msra.mxu0 %v120_v1  ;;  %v118_v3 = vld [vmem:[#allocation5 + $0x68] sm:$0xff]  ;;  %v117_v4 = vld [vmem:[#allocation5 + $0x60] sm:$0xff]  ;;  %v101_v5 = vld [vmem:[#allocation3] sm:$0xf]  ;;  %vm228_vm1 = vcmask 3072  }
  0x17   :  { %v161_v6 = vld [vmem:[#allocation8 + $0x78] sm:$0xff]  ;;  %103 = vst.msk [vmem:[#allocation2] sm:$0xf] %vm102_vm0, %v101_v5  ;;  %v160_v8 = vld [vmem:[#allocation8 + $0x70] sm:$0xff]  ;;  %v159_v9 = vld [vmem:[#allocation8 + $0x68] sm:$0xff] }
  0x18   :  { %126 = vmatpush.msra.mxu0 %v119_v2  ;;  %v116_v7 = vld [vmem:[#allocation5 + $0x58] sm:$0xff]  ;;  %166 = vmatpush.msra.mxu1 %v161_v6  ;;  %v115_v10 = vld [vmem:[#allocation5 + $0x50] sm:$0xff]  ;;  %v158_v11 = vld [vmem:[#allocation8 + $0x60] sm:$0xff] }
  0x19   :  { %v114_v12 = vld [vmem:[#allocation5 + $0x48] sm:$0xff]  ;;  %v157_v13 = vld [vmem:[#allocation8 + $0x58] sm:$0xff]  ;;  %v156_v15 = vld [vmem:[#allocation8 + $0x50] sm:$0xff] }
  0x1a   :  { %127 = vmatpush.msra.mxu0 %v118_v3  ;;  %167 = vmatpush.msra.mxu1 %v160_v8  ;;  %v113_v14 = vld [vmem:[#allocation5 + $0x40] sm:$0xff]  ;;  %v112_v16 = vld [vmem:[#allocation5 + $0x38] sm:$0xff]  ;;  %v155_v17 = vld [vmem:[#allocation8 + $0x48] sm:$0xff] }
  0x1b   :  { %v111_v18 = vld [vmem:[#allocation5 + $0x30] sm:$0xff]  ;;  %v154_v19 = vld [vmem:[#allocation8 + $0x40] sm:$0xff]  ;;  %v153_v21 = vld [vmem:[#allocation8 + $0x38] sm:$0xff] }
  0x1c   :  { %128 = vmatpush.msra.mxu0 %v117_v4  ;;  %168 = vmatpush.msra.mxu1 %v159_v9  ;;  %v110_v20 = vld [vmem:[#allocation5 + $0x28] sm:$0xff]  ;;  %v109_v22 = vld [vmem:[#allocation5 + $0x20] sm:$0xff]  ;;  %v152_v23 = vld [vmem:[#allocation8 + $0x30] sm:$0xff] }
  0x1d   :  { %v108_v24 = vld [vmem:[#allocation5 + $0x18] sm:$0xff]  ;;  %v151_v25 = vld [vmem:[#allocation8 + $0x28] sm:$0xff]  ;;  %v105_v28 = vld [vmem:[#allocation5] sm:$0xff] }
  0x1e   :  { %129 = vmatpush.msra.mxu0 %v116_v7  ;;  %169 = vmatpush.msra.mxu1 %v158_v11  ;;  %v107_v26 = vld [vmem:[#allocation5 + $0x10] sm:$0xff]  ;;  %v106_v27 = vld [vmem:[#allocation5 + $0x8] sm:$0xff]  ;;  %v149_v31 = vld [vmem:[#allocation8 + $0x18] sm:$0xff] }
  0x1f   :  { %v104_v29 = vld [vmem:[#allocation2] sm:$0xff]  ;;  %v150_v30 = vld [vmem:[#allocation8 + $0x20] sm:$0xff]  ;;  %v147_v33 = vld [vmem:[#allocation8 + $0x8] sm:$0xff] }
  0x20   :  { %130 = vmatpush.msra.mxu0 %v115_v10  ;;  %170 = vmatpush.msra.mxu1 %v157_v13  ;;  %v148_v32 = vld [vmem:[#allocation8 + $0x10] sm:$0xff]  ;;  %v146_v34 = vld [vmem:[#allocation8] sm:$0xff]  ;;  %v202_v35 = vld [vmem:[#allocation10 + $0x78] sm:$0xff] }
  0x21   :  { %v201_v36 = vld [vmem:[#allocation10 + $0x70] sm:$0xff]  ;;  %207 = vmatpush.msra.mxu2 %v202_v35  ;;  %v200_v37 = vld [vmem:[#allocation10 + $0x68] sm:$0xff]  ;;  %v199_v38 = vld [vmem:[#allocation10 + $0x60] sm:$0xff] }
  0x22   :  { %131 = vmatpush.msra.mxu0 %v114_v12  ;;  %171 = vmatpush.msra.mxu1 %v156_v15  ;;  %v198_v39 = vld [vmem:[#allocation10 + $0x58] sm:$0xff]  ;;  %v197_v40 = vld [vmem:[#allocation10 + $0x50] sm:$0xff]  ;;  %v196_v41 = vld [vmem:[#allocation10 + $0x48] sm:$0xff] }
  0x23   :  { %208 = vmatpush.msra.mxu2 %v201_v36  ;;  %v195_v42 = vld [vmem:[#allocation10 + $0x40] sm:$0xff]  ;;  %v194_v43 = vld [vmem:[#allocation10 + $0x38] sm:$0xff]  ;;  %v193_v44 = vld [vmem:[#allocation10 + $0x30] sm:$0xff] }
  0x24   :  { %132 = vmatpush.msra.mxu0 %v113_v14  ;;  %172 = vmatpush.msra.mxu1 %v155_v17  ;;  %v192_v45 = vld [vmem:[#allocation10 + $0x28] sm:$0xff]  ;;  %v245_v46 = vld [vmem:[#allocation7] ss:$0 sm:$0xff]  ;;  %v191_v50 = vld [vmem:[#allocation10 + $0x20] sm:$0xff] }
  0x25   :  { %209 = vmatpush.msra.mxu2 %v200_v37  ;;  %v190_v51 = vld [vmem:[#allocation10 + $0x18] sm:$0xff]  ;;  %v189_v52 = vld [vmem:[#allocation10 + $0x10] sm:$0xff]  ;;  %v188_v53 = vld [vmem:[#allocation10 + $0x8] sm:$0xff] }
  0x26   :  { %133 = vmatpush.msra.mxu0 %v112_v16  ;;  %173 = vmatpush.msra.mxu1 %v154_v19  ;;  %v187_v54 = vld [vmem:[#allocation10] sm:$0xff]  ;;  %v246_v55 = vld [vmem:[%s456_s4] ss:$0 sm:$0xff] }
  0x27   :  { %210 = vmatpush.msra.mxu2 %v199_v38  ;;  %v247_v59 = vld [vmem:[%s458_s6] ss:$0 sm:$0xff] }
  0x28   :  { %134 = vmatpush.msra.mxu0 %v111_v18  ;;  %174 = vmatpush.msra.mxu1 %v153_v21 }
  0x29   :  { %211 = vmatpush.msra.mxu2 %v198_v39 }
  0x2a   :  { %135 = vmatpush.msra.mxu0 %v110_v20  ;;  %175 = vmatpush.msra.mxu1 %v152_v23 }
  0x2b   :  { %212 = vmatpush.msra.mxu2 %v197_v40 }
  0x2c   :  { %136 = vmatpush.msra.mxu0 %v109_v22  ;;  %176 = vmatpush.msra.mxu1 %v151_v25 }
  0x2d   :  { %213 = vmatpush.msra.mxu2 %v196_v41 }
  0x2e   :  { %137 = vmatpush.msra.mxu0 %v108_v24  ;;  %177 = vmatpush.msra.mxu1 %v150_v30 }
  0x2f   :  { %214 = vmatpush.msra.mxu2 %v195_v42 }
  0x30   :  { %138 = vmatpush.msra.mxu0 %v107_v26  ;;  %178 = vmatpush.msra.mxu1 %v149_v31 }
  0x31   :  { %215 = vmatpush.msra.mxu2 %v194_v43 }
  0x32   :  { %139 = vmatpush.msra.mxu0 %v106_v27  ;;  %179 = vmatpush.msra.mxu1 %v148_v32 }
  0x33   :  { %216 = vmatpush.msra.mxu2 %v193_v44 }
  0x34   :  { %140 = vmatpush.msra.mxu0 %v105_v28  ;;  %180 = vmatpush.msra.mxu1 %v147_v33 }
  0x35   :  { %141 = vmatmul.f32.vlgmr.msra.gmra.mxu0 %v104_v29  ;;  %217 = vmatpush.msra.mxu2 %v192_v45 }
  0x36   :  { %181 = vmatpush.msra.mxu1 %v146_v34 }
  0x37   :  { %218 = vmatpush.msra.mxu2 %v191_v50 }
  0x39   :  { %219 = vmatpush.msra.mxu2 %v190_v51 }
  0x3b   :  { %220 = vmatpush.msra.mxu2 %v189_v52 }
  0x3d   :  { %221 = vmatpush.msra.mxu2 %v188_v53 }
  0x3f   :  { %222 = vmatpush.msra.mxu2 %v187_v54 }
  0xb2   :  { %v142_v47 = vpop.f32.mrf.mxu0 }
  0xb3   :  { %v143_v48 = vadd.f32 %v245_v46, %v142_v47 }
  0xb5   :  { %248 = vtanh.f32 %v143_v48 }
  0xbb   :  { %v249_v49 = vpop.eup %248 }
  0xbc   :  { %182 = vmatmul.f32.vlgmr.msra.gmra.mxu1 %v249_v49 }
 0x139   :  { %v183_v56 = vpop.f32.mrf.mxu1 }
 0x13a   :  { %v184_v57 = vadd.f32 %v246_v55, %v183_v56 }
 0x13c   :  { %250 = vtanh.f32 %v184_v57 }
 0x142   :  { %v251_v58 = vpop.eup %250 }
 0x143   :  { %223 = vmatmul.f32.vlgmr.msra.gmra.mxu2 %v251_v58 }
 0x1c6   :  { %v224_v60 = vpop.f32.mrf.mxu2 }
 0x1c7   :  { %v225_v61 = vadd.f32 %v247_v59, %v224_v60 }
 0x1c9   :  { %252 = vtanh.f32 %v225_v61 }
 0x1cf   :  { %v253_v62 = vpop.eup %252 }
 0x1d0   :  { %229 = vst.msk [vmem:[%s459_s7] sm:$0xf] %vm228_vm1, %v253_v62 }
 0x1d1   :  { %234 = vsyncpa [#allocation4], 1 }
 0x1d2   :  { %235 = vsyncpa [#allocation6], 1 }
 0x1d3   :  { %236 = vsyncpa [#allocation9], 1 }

</bundles_post_ra>
